<compile_context>
chip_gen: v7x
topology: tpu7x:2x2x1
jax: 0.10.0
libtpu: 0.0.40
codegen_flags: <defaults>
</compile_context>

<pallas_src>
import functools

import jax
import jax.numpy as jnp
from jax.experimental import pallas as pl
from jax.experimental.pallas import tpu as pltpu


def _attention_kernel(x_ref, wqkv_ref, wo_ref, o_ref, *,
                      heads, dim_head, tokens_per_batch, batches_per_block):
    # x_ref    : (rows, dim)            rows = batches_per_block * tokens_per_batch
    # wqkv_ref : (dim, 3*heads*d)  bf16 columns = [q_h0..q_hH | k_h0..k_hH | v_h0..v_hH]
    #                                    (softmax scale already folded into q columns)
    # wo_ref   : (heads, d, dim)   bf16
    # o_ref    : (rows, dim)
    rows = x_ref.shape[0]
    dim = o_ref.shape[1]
    n = tokens_per_batch
    bt = batches_per_block
    d = dim_head
    inner = heads * d

    x = x_ref[...].astype(jnp.bfloat16)                     # (rows, dim)

    # One lane-dense fused QKV projection for all heads:
    # (rows, dim) @ (dim, 3*inner), bf16 operands, f32 accumulation on the MXU.
    qkv = jnp.dot(x, wqkv_ref[...], preferred_element_type=jnp.float32)

    acc = jnp.zeros((rows, dim), jnp.float32)

    # Static unroll is fine for small head counts (heads=4 here).
    # TODO(synk): use lax.fori_loop / a grid axis when heads or rows grow.
    for h in range(heads):
        # Static column slices of the fused QKV result; free leading-dim
        # reshape (rows, d) -> (bt, n, d) so attention is batched per batch
        # element (no cross-batch mixing, no block-diagonal bias needed).
        q = qkv[:, h * d:(h + 1) * d].astype(jnp.bfloat16).reshape(bt, n, d)
        k = qkv[:, inner + h * d:inner + (h + 1) * d].astype(jnp.bfloat16).reshape(bt, n, d)
        v = qkv[:, 2 * inner + h * d:2 * inner + (h + 1) * d].astype(jnp.bfloat16).reshape(bt, n, d)

        # dots = (q * scale) @ k^T per batch element -- scale folded into W_q.
        dots = jnp.einsum('bqd,bkd->bqk', q, k,
                          preferred_element_type=jnp.float32)      # (bt, n, n)

        # Numerically-stable softmax over the n key columns, all in f32.
        dots = dots - jnp.max(dots, axis=-1, keepdims=True)
        p = jnp.exp(dots)
        attn = p * pl.reciprocal(jnp.sum(p, axis=-1, keepdims=True), approx=True)

        o_h = jnp.einsum('bqk,bkd->bqd', attn.astype(jnp.bfloat16), v,
                         preferred_element_type=jnp.float32)        # (bt, n, d)
        o_h = o_h.reshape(rows, d).astype(jnp.bfloat16)

        # Output projection accumulated per head: y = sum_h o_h @ W_out[h].
        acc = acc + jnp.dot(o_h, wo_ref[h], preferred_element_type=jnp.float32)

    o_ref[...] = acc.astype(o_ref.dtype)


def prepare_params(w_qkv, w_out, *, heads, dim_head, param_dtype=jnp.bfloat16):
    """One-time conversion of torch-layout weights to kernel layout.

    w_qkv: (3*inner, dim) torch Linear weight (out, in)
    w_out: (dim, inner)   torch Linear weight (out, in)
    Returns:
      w_qkv_packed: (dim, 3*inner) bf16, columns [q heads | k heads | v heads],
                    with dim_head**-0.5 folded into the q columns.
      wo_h        : (heads, d, dim) bf16.
    """
    inner = heads * dim_head
    dim = w_qkv.shape[1]
    scale = dim_head ** (-0.5)

    w = jnp.asarray(w_qkv, jnp.float32)                      # (3*inner, dim)
    wq, wk, wv = jnp.split(w, 3, axis=0)                     # (inner, dim) each
    wq = wq * scale                                          # fold softmax scale
    w_qkv_packed = jnp.concatenate([wq, wk, wv], axis=0).T.astype(param_dtype)  # (dim, 3*inner)

    wo_h = jnp.asarray(w_out, jnp.float32).reshape(dim, heads, dim_head
                                                   ).transpose(1, 2, 0).astype(param_dtype)
    return w_qkv_packed, wo_h


def _default_batch_tile(b, n, max_rows=1024):
    """Prefer >=2 grid steps (v7x has 2 TensorCores; 'parallel' axis shards
    them), keep rows = batch_tile*n sublane-aligned (multiple of 8) when the
    block is smaller than the full array, and bound rows for VMEM."""
    best = b
    for bt in range(b, 0, -1):
        if b % bt != 0:
            continue
        rows = bt * n
        if rows % 8 != 0 and bt != b:
            continue                      # sublane alignment for partial blocks
        if rows > max_rows and bt > 1:
            continue                      # VMEM cap (see TODO: flash for huge n)
        best = bt
        if b // bt >= 2:
            break                         # enough steps for both v7x cores
    return best


def attention_forward(x, params, *, heads, dim_head, batch_tile=None,
                      compute_dtype=jnp.bfloat16, vmem_limit_bytes=None):
    """x: (b, n, dim); params from prepare_params()."""
    b, n, dim = x.shape
    w_qkv_packed, wo_h = params
    inner = heads * dim_head

    if batch_tile is None:
        batch_tile = _default_batch_tile(b, n)
    assert b % batch_tile == 0
    rows = batch_tile * n
    assert rows % 8 == 0 or batch_tile == b, \
        "rows = batch_tile*n must be a multiple of 8 when batch_tile < b"

    # bf16 input halves HBM->VMEM DMA bytes (the kernel computes in bf16/f32
    # regardless); output stays in the caller's dtype.
    x2 = x.reshape(b * n, dim).astype(compute_dtype)

    kernel = functools.partial(
        _attention_kernel, heads=heads, dim_head=dim_head,
        tokens_per_batch=n, batches_per_block=batch_tile)

    y2 = pl.pallas_call(
        kernel,
        out_shape=jax.ShapeDtypeStruct((b * n, dim), x.dtype),
        grid_spec=pltpu.PrefetchScalarGridSpec(
            num_scalar_prefetch=0,
            grid=(b // batch_tile,),
            in_specs=[
                pl.BlockSpec((rows, dim), lambda i: (i, 0)),
                pl.BlockSpec((dim, 3 * inner), lambda i: (0, 0)),
                pl.BlockSpec((heads, dim_head, dim), lambda i: (0, 0, 0)),
            ],
            out_specs=pl.BlockSpec((rows, dim), lambda i: (i, 0)),
        ),
        compiler_params=pltpu.CompilerParams(
            dimension_semantics=("parallel",),
            vmem_limit_bytes=vmem_limit_bytes),
    )(x2, w_qkv_packed, wo_h)

    return y2.reshape(b, n, dim)


def attention_reference(x, w_qkv, w_out, *, heads, dim_head):
    """Pure-JAX f32 reference mirroring the PyTorch forward exactly."""
    b, n, dim = x.shape
    inner = heads * dim_head
    scale = dim_head ** (-0.5)

    qkv = x @ w_qkv.T                                        # (b, n, 3*inner)
    q, k, v = jnp.split(qkv, 3, axis=-1)

    def to_heads(t):
        return t.reshape(b, n, heads, dim_head).transpose(0, 2, 1, 3)  # (b,h,n,d)

    q, k, v = map(to_heads, (q, k, v))
    dots = jnp.einsum('bhid,bhjd->bhij', q, k) * scale
    attn = jax.nn.softmax(dots, axis=-1)
    out = jnp.einsum('bhij,bhjd->bhid', attn, v)
    out = out.transpose(0, 2, 1, 3).reshape(b, n, inner)
    return out @ w_out.T


if __name__ == "__main__":
    # Small, module-consistent shapes.
    b, n, dim = 2, 8, 32
    heads, dim_head = 4, 16
    inner = heads * dim_head  # 64; project_out=True since heads != 1

    key = jax.random.PRNGKey(0)
    kx, kq, ko = jax.random.split(key, 3)

    x = jax.random.normal(kx, (b, n, dim), dtype=jnp.float32)
    # torch Linear weight convention: (out_features, in_features)
    w_qkv = jax.random.normal(kq, (3 * inner, dim), dtype=jnp.float32) * 0.05
    w_out = jax.random.normal(ko, (dim, inner), dtype=jnp.float32) * 0.05

    # One-time weight repack (fused QKV layout, bf16, scale folded into W_q).
    params = prepare_params(w_qkv, w_out, heads=heads, dim_head=dim_head)

    y = attention_forward(x, params, heads=heads, dim_head=dim_head)
    y = jax.block_until_ready(y)

    y_ref = attention_reference(x, w_qkv, w_out, heads=heads, dim_head=dim_head)
    # Tolerance covers bf16 MXU operands + approx reciprocal in the softmax
    # (f32 accumulation and f32 softmax keep the error well below this).
    assert jnp.allclose(y, y_ref, atol=2e-2, rtol=2e-2), (
        "mismatch vs reference, max abs diff = %e" % float(jnp.max(jnp.abs(y - y_ref))))

    print("KERNEL_OK")
</pallas_src>

<mosaic_0001>
module attributes {stable_mosaic.version = 11 : i64} {
  func.func @_attention_kernel(%arg0: i32, %arg1: memref<8x32xbf16, #tpu.memory_space<vmem>>, %arg2: memref<32x192xbf16, #tpu.memory_space<vmem>>, %arg3: memref<4x16x32xbf16, #tpu.memory_space<vmem>>, %arg4: memref<8x32xf32, #tpu.memory_space<vmem>>) attributes {dimension_semantics = [#tpu.dimension_semantics<parallel>], iteration_bounds = array<i64: 2>, scalar_prefetch = 0 : i64, scratch_operands = 0 : i64, tpu.core_type = #tpu.core_type<tc>, window_params = [{transform_indices = @transform_0, window_bounds = array<i64: 8, 32>}, {pipeline_mode = #tpu.pipeline_mode<synchronous>, transform_indices = @transform_1, window_bounds = array<i64: 32, 192>}, {pipeline_mode = #tpu.pipeline_mode<synchronous>, transform_indices = @transform_2, window_bounds = array<i64: 4, 16, 32>}, {transform_indices = @transform_3, window_bounds = array<i64: 8, 32>}]} {
    %c0 = arith.constant 0 : index
    %c0_0 = arith.constant 0 : index
    %0 = vector.load %arg1[%c0, %c0_0] : memref<8x32xbf16, #tpu.memory_space<vmem>>, vector<8x32xbf16>
    %c0_1 = arith.constant 0 : index
    %c0_2 = arith.constant 0 : index
    %1 = vector.load %arg2[%c0_1, %c0_2] : memref<32x192xbf16, #tpu.memory_space<vmem>>, vector<32x192xbf16>
    %cst = arith.constant dense<0.000000e+00> : vector<8x192xf32>
    %2 = tpu.matmul %0, %1, %cst {dimension_numbers = #tpu.dot_dimension_numbers<[1], [0], [0], [1], [0, 0, 1, 1], [], []>} : vector<8x32xbf16>, vector<32x192xbf16>, vector<8x192xf32> -> vector<8x192xf32>
    %cst_3 = arith.constant 0.000000e+00 : f32
    %3 = vector.broadcast %cst_3 : f32 to vector<8x32xf32>
    %4 = vector.extract_strided_slice %2 {offsets = [0, 0], sizes = [8, 16], strides = [1, 1]} : vector<8x192xf32> to vector<8x16xf32>
    %5 = arith.truncf %4 : vector<8x16xf32> to vector<8x16xbf16>
    %6 = vector.shape_cast %5 : vector<8x16xbf16> to vector<1x8x16xbf16>
    %7 = vector.extract_strided_slice %2 {offsets = [0, 64], sizes = [8, 16], strides = [1, 1]} : vector<8x192xf32> to vector<8x16xf32>
    %8 = arith.truncf %7 : vector<8x16xf32> to vector<8x16xbf16>
    %9 = vector.shape_cast %8 : vector<8x16xbf16> to vector<1x8x16xbf16>
    %10 = vector.extract_strided_slice %2 {offsets = [0, 128], sizes = [8, 16], strides = [1, 1]} : vector<8x192xf32> to vector<8x16xf32>
    %11 = arith.truncf %10 : vector<8x16xf32> to vector<8x16xbf16>
    %12 = vector.shape_cast %11 : vector<8x16xbf16> to vector<1x8x16xbf16>
    "tpu.trace_start"() <{level = 10 : i32, message = "bqd,bkd->bqk"}> : () -> ()
    %cst_4 = arith.constant dense<0.000000e+00> : vector<1x8x8xf32>
    %13 = tpu.matmul %6, %9, %cst_4 {dimension_numbers = #tpu.dot_dimension_numbers<[2], [2], [1], [1], [0, 0, 0, 1, 1, 1], [0], [0]>} : vector<1x8x16xbf16>, vector<1x8x16xbf16>, vector<1x8x8xf32> -> vector<1x8x8xf32>
    "tpu.trace_stop"() : () -> ()
    %cst_5 = arith.constant dense<0xFF800000> : vector<1x8xf32>
    %14 = vector.multi_reduction <maximumf>, %13, %cst_5 [2] : vector<1x8x8xf32> to vector<1x8xf32>
    %15 = vector.shape_cast %14 : vector<1x8xf32> to vector<1x8x1xf32>
    %16 = vector.broadcast %15 : vector<1x8x1xf32> to vector<1x8x8xf32>
    %17 = arith.subf %13, %16 : vector<1x8x8xf32>
    %18 = math.exp %17 : vector<1x8x8xf32>
    %cst_6 = arith.constant dense<0.000000e+00> : vector<1x8xf32>
    %19 = vector.multi_reduction <add>, %18, %cst_6 [2] : vector<1x8x8xf32> to vector<1x8xf32>
    %20 = vector.shape_cast %19 : vector<1x8xf32> to vector<1x8x1xf32>
    %21 = tpu.reciprocal %20 {approx = true} : vector<1x8x1xf32> -> vector<1x8x1xf32>
    %22 = vector.broadcast %21 : vector<1x8x1xf32> to vector<1x8x8xf32>
    %23 = arith.mulf %18, %22 : vector<1x8x8xf32>
    %24 = arith.truncf %23 : vector<1x8x8xf32> to vector<1x8x8xbf16>
    "tpu.trace_start"() <{level = 10 : i32, message = "bqk,bkd->bqd"}> : () -> ()
    %cst_7 = arith.constant dense<0.000000e+00> : vector<1x8x16xf32>
    %25 = tpu.matmul %24, %12, %cst_7 {dimension_numbers = #tpu.dot_dimension_numbers<[2], [1], [1], [2], [0, 0, 0, 1, 1, 2], [0], [0]>} : vector<1x8x8xbf16>, vector<1x8x16xbf16>, vector<1x8x16xf32> -> vector<1x8x16xf32>
    "tpu.trace_stop"() : () -> ()
    %26 = vector.shape_cast %25 : vector<1x8x16xf32> to vector<8x16xf32>
    %27 = arith.truncf %26 : vector<8x16xf32> to vector<8x16xbf16>
    %c0_8 = arith.constant 0 : index
    %c0_9 = arith.constant 0 : index
    %c0_10 = arith.constant 0 : index
    %28 = vector.load %arg3[%c0_8, %c0_9, %c0_10] : memref<4x16x32xbf16, #tpu.memory_space<vmem>>, vector<1x16x32xbf16>
    %29 = vector.shape_cast %28 : vector<1x16x32xbf16> to vector<16x32xbf16>
    %cst_11 = arith.constant dense<0.000000e+00> : vector<8x32xf32>
    %30 = tpu.matmul %27, %29, %cst_11 {dimension_numbers = #tpu.dot_dimension_numbers<[1], [0], [0], [1], [0, 0, 1, 1], [], []>} : vector<8x16xbf16>, vector<16x32xbf16>, vector<8x32xf32> -> vector<8x32xf32>
    %31 = arith.addf %3, %30 : vector<8x32xf32>
    %32 = vector.extract_strided_slice %2 {offsets = [0, 16], sizes = [8, 16], strides = [1, 1]} : vector<8x192xf32> to vector<8x16xf32>
    %33 = arith.truncf %32 : vector<8x16xf32> to vector<8x16xbf16>
    %34 = vector.shape_cast %33 : vector<8x16xbf16> to vector<1x8x16xbf16>
    %35 = vector.extract_strided_slice %2 {offsets = [0, 80], sizes = [8, 16], strides = [1, 1]} : vector<8x192xf32> to vector<8x16xf32>
    %36 = arith.truncf %35 : vector<8x16xf32> to vector<8x16xbf16>
    %37 = vector.shape_cast %36 : vector<8x16xbf16> to vector<1x8x16xbf16>
    %38 = vector.extract_strided_slice %2 {offsets = [0, 144], sizes = [8, 16], strides = [1, 1]} : vector<8x192xf32> to vector<8x16xf32>
    %39 = arith.truncf %38 : vector<8x16xf32> to vector<8x16xbf16>
    %40 = vector.shape_cast %39 : vector<8x16xbf16> to vector<1x8x16xbf16>
    "tpu.trace_start"() <{level = 10 : i32, message = "bqd,bkd->bqk"}> : () -> ()
    %cst_12 = arith.constant dense<0.000000e+00> : vector<1x8x8xf32>
    %41 = tpu.matmul %34, %37, %cst_12 {dimension_numbers = #tpu.dot_dimension_numbers<[2], [2], [1], [1], [0, 0, 0, 1, 1, 1], [0], [0]>} : vector<1x8x16xbf16>, vector<1x8x16xbf16>, vector<1x8x8xf32> -> vector<1x8x8xf32>
    "tpu.trace_stop"() : () -> ()
    %cst_13 = arith.constant dense<0xFF800000> : vector<1x8xf32>
    %42 = vector.multi_reduction <maximumf>, %41, %cst_13 [2] : vector<1x8x8xf32> to vector<1x8xf32>
    %43 = vector.shape_cast %42 : vector<1x8xf32> to vector<1x8x1xf32>
    %44 = vector.broadcast %43 : vector<1x8x1xf32> to vector<1x8x8xf32>
    %45 = arith.subf %41, %44 : vector<1x8x8xf32>
    %46 = math.exp %45 : vector<1x8x8xf32>
    %cst_14 = arith.constant dense<0.000000e+00> : vector<1x8xf32>
    %47 = vector.multi_reduction <add>, %46, %cst_14 [2] : vector<1x8x8xf32> to vector<1x8xf32>
    %48 = vector.shape_cast %47 : vector<1x8xf32> to vector<1x8x1xf32>
    %49 = tpu.reciprocal %48 {approx = true} : vector<1x8x1xf32> -> vector<1x8x1xf32>
    %50 = vector.broadcast %49 : vector<1x8x1xf32> to vector<1x8x8xf32>
    %51 = arith.mulf %46, %50 : vector<1x8x8xf32>
    %52 = arith.truncf %51 : vector<1x8x8xf32> to vector<1x8x8xbf16>
    "tpu.trace_start"() <{level = 10 : i32, message = "bqk,bkd->bqd"}> : () -> ()
    %cst_15 = arith.constant dense<0.000000e+00> : vector<1x8x16xf32>
    %53 = tpu.matmul %52, %40, %cst_15 {dimension_numbers = #tpu.dot_dimension_numbers<[2], [1], [1], [2], [0, 0, 0, 1, 1, 2], [0], [0]>} : vector<1x8x8xbf16>, vector<1x8x16xbf16>, vector<1x8x16xf32> -> vector<1x8x16xf32>
    "tpu.trace_stop"() : () -> ()
    %54 = vector.shape_cast %53 : vector<1x8x16xf32> to vector<8x16xf32>
    %55 = arith.truncf %54 : vector<8x16xf32> to vector<8x16xbf16>
    %c1 = arith.constant 1 : index
    %c0_16 = arith.constant 0 : index
    %c0_17 = arith.constant 0 : index
    %56 = vector.load %arg3[%c1, %c0_16, %c0_17] : memref<4x16x32xbf16, #tpu.memory_space<vmem>>, vector<1x16x32xbf16>
    %57 = vector.shape_cast %56 : vector<1x16x32xbf16> to vector<16x32xbf16>
    %cst_18 = arith.constant dense<0.000000e+00> : vector<8x32xf32>
    %58 = tpu.matmul %55, %57, %cst_18 {dimension_numbers = #tpu.dot_dimension_numbers<[1], [0], [0], [1], [0, 0, 1, 1], [], []>} : vector<8x16xbf16>, vector<16x32xbf16>, vector<8x32xf32> -> vector<8x32xf32>
    %59 = arith.addf %31, %58 : vector<8x32xf32>
    %60 = vector.extract_strided_slice %2 {offsets = [0, 32], sizes = [8, 16], strides = [1, 1]} : vector<8x192xf32> to vector<8x16xf32>
    %61 = arith.truncf %60 : vector<8x16xf32> to vector<8x16xbf16>
    %62 = vector.shape_cast %61 : vector<8x16xbf16> to vector<1x8x16xbf16>
    %63 = vector.extract_strided_slice %2 {offsets = [0, 96], sizes = [8, 16], strides = [1, 1]} : vector<8x192xf32> to vector<8x16xf32>
    %64 = arith.truncf %63 : vector<8x16xf32> to vector<8x16xbf16>
    %65 = vector.shape_cast %64 : vector<8x16xbf16> to vector<1x8x16xbf16>
    %66 = vector.extract_strided_slice %2 {offsets = [0, 160], sizes = [8, 16], strides = [1, 1]} : vector<8x192xf32> to vector<8x16xf32>
    %67 = arith.truncf %66 : vector<8x16xf32> to vector<8x16xbf16>
    %68 = vector.shape_cast %67 : vector<8x16xbf16> to vector<1x8x16xbf16>
    "tpu.trace_start"() <{level = 10 : i32, message = "bqd,bkd->bqk"}> : () -> ()
    %cst_19 = arith.constant dense<0.000000e+00> : vector<1x8x8xf32>
    %69 = tpu.matmul %62, %65, %cst_19 {dimension_numbers = #tpu.dot_dimension_numbers<[2], [2], [1], [1], [0, 0, 0, 1, 1, 1], [0], [0]>} : vector<1x8x16xbf16>, vector<1x8x16xbf16>, vector<1x8x8xf32> -> vector<1x8x8xf32>
    "tpu.trace_stop"() : () -> ()
    %cst_20 = arith.constant dense<0xFF800000> : vector<1x8xf32>
    %70 = vector.multi_reduction <maximumf>, %69, %cst_20 [2] : vector<1x8x8xf32> to vector<1x8xf32>
    %71 = vector.shape_cast %70 : vector<1x8xf32> to vector<1x8x1xf32>
    %72 = vector.broadcast %71 : vector<1x8x1xf32> to vector<1x8x8xf32>
    %73 = arith.subf %69, %72 : vector<1x8x8xf32>
    %74 = math.exp %73 : vector<1x8x8xf32>
    %cst_21 = arith.constant dense<0.000000e+00> : vector<1x8xf32>
    %75 = vector.multi_reduction <add>, %74, %cst_21 [2] : vector<1x8x8xf32> to vector<1x8xf32>
    %76 = vector.shape_cast %75 : vector<1x8xf32> to vector<1x8x1xf32>
    %77 = tpu.reciprocal %76 {approx = true} : vector<1x8x1xf32> -> vector<1x8x1xf32>
    %78 = vector.broadcast %77 : vector<1x8x1xf32> to vector<1x8x8xf32>
    %79 = arith.mulf %74, %78 : vector<1x8x8xf32>
    %80 = arith.truncf %79 : vector<1x8x8xf32> to vector<1x8x8xbf16>
    "tpu.trace_start"() <{level = 10 : i32, message = "bqk,bkd->bqd"}> : () -> ()
    %cst_22 = arith.constant dense<0.000000e+00> : vector<1x8x16xf32>
    %81 = tpu.matmul %80, %68, %cst_22 {dimension_numbers = #tpu.dot_dimension_numbers<[2], [1], [1], [2], [0, 0, 0, 1, 1, 2], [0], [0]>} : vector<1x8x8xbf16>, vector<1x8x16xbf16>, vector<1x8x16xf32> -> vector<1x8x16xf32>
    "tpu.trace_stop"() : () -> ()
    %82 = vector.shape_cast %81 : vector<1x8x16xf32> to vector<8x16xf32>
    %83 = arith.truncf %82 : vector<8x16xf32> to vector<8x16xbf16>
    %c2 = arith.constant 2 : index
    %c0_23 = arith.constant 0 : index
    %c0_24 = arith.constant 0 : index
    %84 = vector.load %arg3[%c2, %c0_23, %c0_24] : memref<4x16x32xbf16, #tpu.memory_space<vmem>>, vector<1x16x32xbf16>
    %85 = vector.shape_cast %84 : vector<1x16x32xbf16> to vector<16x32xbf16>
    %cst_25 = arith.constant dense<0.000000e+00> : vector<8x32xf32>
    %86 = tpu.matmul %83, %85, %cst_25 {dimension_numbers = #tpu.dot_dimension_numbers<[1], [0], [0], [1], [0, 0, 1, 1], [], []>} : vector<8x16xbf16>, vector<16x32xbf16>, vector<8x32xf32> -> vector<8x32xf32>
    %87 = arith.addf %59, %86 : vector<8x32xf32>
    %88 = vector.extract_strided_slice %2 {offsets = [0, 48], sizes = [8, 16], strides = [1, 1]} : vector<8x192xf32> to vector<8x16xf32>
    %89 = arith.truncf %88 : vector<8x16xf32> to vector<8x16xbf16>
    %90 = vector.shape_cast %89 : vector<8x16xbf16> to vector<1x8x16xbf16>
    %91 = vector.extract_strided_slice %2 {offsets = [0, 112], sizes = [8, 16], strides = [1, 1]} : vector<8x192xf32> to vector<8x16xf32>
    %92 = arith.truncf %91 : vector<8x16xf32> to vector<8x16xbf16>
    %93 = vector.shape_cast %92 : vector<8x16xbf16> to vector<1x8x16xbf16>
    %94 = vector.extract_strided_slice %2 {offsets = [0, 176], sizes = [8, 16], strides = [1, 1]} : vector<8x192xf32> to vector<8x16xf32>
    %95 = arith.truncf %94 : vector<8x16xf32> to vector<8x16xbf16>
    %96 = vector.shape_cast %95 : vector<8x16xbf16> to vector<1x8x16xbf16>
    "tpu.trace_start"() <{level = 10 : i32, message = "bqd,bkd->bqk"}> : () -> ()
    %cst_26 = arith.constant dense<0.000000e+00> : vector<1x8x8xf32>
    %97 = tpu.matmul %90, %93, %cst_26 {dimension_numbers = #tpu.dot_dimension_numbers<[2], [2], [1], [1], [0, 0, 0, 1, 1, 1], [0], [0]>} : vector<1x8x16xbf16>, vector<1x8x16xbf16>, vector<1x8x8xf32> -> vector<1x8x8xf32>
    "tpu.trace_stop"() : () -> ()
    %cst_27 = arith.constant dense<0xFF800000> : vector<1x8xf32>
    %98 = vector.multi_reduction <maximumf>, %97, %cst_27 [2] : vector<1x8x8xf32> to vector<1x8xf32>
    %99 = vector.shape_cast %98 : vector<1x8xf32> to vector<1x8x1xf32>
    %100 = vector.broadcast %99 : vector<1x8x1xf32> to vector<1x8x8xf32>
    %101 = arith.subf %97, %100 : vector<1x8x8xf32>
    %102 = math.exp %101 : vector<1x8x8xf32>
    %cst_28 = arith.constant dense<0.000000e+00> : vector<1x8xf32>
    %103 = vector.multi_reduction <add>, %102, %cst_28 [2] : vector<1x8x8xf32> to vector<1x8xf32>
    %104 = vector.shape_cast %103 : vector<1x8xf32> to vector<1x8x1xf32>
    %105 = tpu.reciprocal %104 {approx = true} : vector<1x8x1xf32> -> vector<1x8x1xf32>
    %106 = vector.broadcast %105 : vector<1x8x1xf32> to vector<1x8x8xf32>
    %107 = arith.mulf %102, %106 : vector<1x8x8xf32>
    %108 = arith.truncf %107 : vector<1x8x8xf32> to vector<1x8x8xbf16>
    "tpu.trace_start"() <{level = 10 : i32, message = "bqk,bkd->bqd"}> : () -> ()
    %cst_29 = arith.constant dense<0.000000e+00> : vector<1x8x16xf32>
    %109 = tpu.matmul %108, %96, %cst_29 {dimension_numbers = #tpu.dot_dimension_numbers<[2], [1], [1], [2], [0, 0, 0, 1, 1, 2], [0], [0]>} : vector<1x8x8xbf16>, vector<1x8x16xbf16>, vector<1x8x16xf32> -> vector<1x8x16xf32>
    "tpu.trace_stop"() : () -> ()
    %110 = vector.shape_cast %109 : vector<1x8x16xf32> to vector<8x16xf32>
    %111 = arith.truncf %110 : vector<8x16xf32> to vector<8x16xbf16>
    %c3 = arith.constant 3 : index
    %c0_30 = arith.constant 0 : index
    %c0_31 = arith.constant 0 : index
    %112 = vector.load %arg3[%c3, %c0_30, %c0_31] : memref<4x16x32xbf16, #tpu.memory_space<vmem>>, vector<1x16x32xbf16>
    %113 = vector.shape_cast %112 : vector<1x16x32xbf16> to vector<16x32xbf16>
    %cst_32 = arith.constant dense<0.000000e+00> : vector<8x32xf32>
    %114 = tpu.matmul %111, %113, %cst_32 {dimension_numbers = #tpu.dot_dimension_numbers<[1], [0], [0], [1], [0, 0, 1, 1], [], []>} : vector<8x16xbf16>, vector<16x32xbf16>, vector<8x32xf32> -> vector<8x32xf32>
    %115 = arith.addf %87, %114 : vector<8x32xf32>
    %c0_33 = arith.constant 0 : index
    %c0_34 = arith.constant 0 : index
    %116 = vector.load %arg4[%c0_33, %c0_34] : memref<8x32xf32, #tpu.memory_space<vmem>>, vector<8x32xf32>
    tpu.vector_store %arg4[%c0_33, %c0_34], %115 {strides = array<i32>} : memref<8x32xf32, #tpu.memory_space<vmem>>, vector<8x32xf32>,
    return
  }
  func.func @transform_0(%arg0: i32) -> (i32, i32) {
    %c0_i32 = arith.constant 0 : i32
    %c0_i32_0 = arith.constant 0 : i32
    return %arg0, %c0_i32 : i32, i32
  }
  func.func @transform_1(%arg0: i32) -> (i32, i32) {
    %c0_i32 = arith.constant 0 : i32
    %c0_i32_0 = arith.constant 0 : i32
    %c0_i32_1 = arith.constant 0 : i32
    return %c0_i32, %c0_i32_0 : i32, i32
  }
  func.func @transform_2(%arg0: i32) -> (i32, i32, i32) {
    %c0_i32 = arith.constant 0 : i32
    %c0_i32_0 = arith.constant 0 : i32
    %c0_i32_1 = arith.constant 0 : i32
    %c0_i32_2 = arith.constant 0 : i32
    return %c0_i32, %c0_i32_0, %c0_i32_1 : i32, i32, i32
  }
  func.func @transform_3(%arg0: i32) -> (i32, i32) {
    %c0_i32 = arith.constant 0 : i32
    %c0_i32_0 = arith.constant 0 : i32
    return %arg0, %c0_i32 : i32, i32
  }
}

</mosaic_0001>

<bundles_post_ra>
// kernel: tpu_custom_call.1
= control target key start
LH: loop header
LB: loop body
LE: loop exit
PB: predicated region body
PF: predicated region fallthrough
CT: control target
= control target key end

     0   :  { %8 = vsyncpa [#allocation3], 0  ;;  %s1812_s0 = inlined_call_operand.hbm [shape: bf16[16,32], index: 0, kind: input, shape index: {}]   ;;  %s1813_s1 = inlined_call_operand.hbm [shape: bf16[32,192], index: 1, kind: input, shape index: {}]   ;;  %s1814_s2 = inlined_call_operand.hbm [shape: bf16[4,16,32], index: 2, kind: input, shape index: {}]   ;;  %s1815_s3 = inlined_call_operand.hbm [shape: f32[16,32], index: 3, kind: output, shape index: {}]  }
   0x1   :  { %10 = vsyncpa [#allocation3 + $0x1], 0 }
   0x2   :  { %11 = vsyncpa [#allocation6], 0 }
   0x3   :  { %12 = vsyncpa [#allocation4], 0 }
   0x4   :  { %14 = vsyncpa [#allocation4 + $0x1], 0  ;;  %s1494_s12 = smov 0   ;;  %s1496_s13 = smov 0  }
   0x5   :  { %s1498_s14 = smov 0   ;;  %s1500_s15 = smov 0  }
   0x6 LB: > { %s1515_s16 = sadd.s32 4294967295, %s1454_s15   ;;  %s1046_s17 = sadd.s32 4294967294, %s1454_s15   ;;  %s1454_s15 = sphi %s1500_s15, %s1835_s15   ;;  %s1450_s14 = sphi %s1498_s14, %s1834_s14   ;;  %s1446_s13 = sphi %s1496_s13, %s1833_s13   ;;  %s1442_s12 = sphi %s1494_s12, %s1832_s12  }
   0x7   : > { %p40_p0 = scmp.ne.s32.totalorder %s1446_s13, %s1442_s12  ;;  %p1816_p1 = scmp.eq.s32.totalorder %s1515_s16, 0 }
   0x8   : > { %p112_p3 = scmp.eq.s32.totalorder %s1046_s17, 1  ;;  %p1047_p5 = scmp.ge.s32.totalorder %s1454_s15, 1 }
   0x9   : > { %p1524_p4 = por %p1816_p1, %p40_p0  ;;  %p119_p7 = scmp.lt.s32.totalorder %s1454_s15, 3 }
   0xa   : > { %p1529_p6 = por %p112_p3, %p40_p0  ;;  %s1456_s21 = smov [#allocation5]  }
   0xb   : > { %s1819_s18 = scalar_select %p1524_p4, 1, 0 }
   0xc   : > { %s1820_s19 = scalar_select %p1529_p6, 1, 0 }
   0xd   : > { %p1534_p8 = pnand %p1047_p5, %p119_p7  ;;  %s131_s22 = sshll.u32 %s1456_s21, 4  ;;  %s1538_s22 = int_to_ptr.vmem [resolvable:$true] %s131_s22 }
   0xe   : > { %s1457_s24 = smov [#allocation7]   ;;  %s1298_s28 = scalar_lea.hbm %s1813_s1, 512 }
   0xf   : > { %p1203_p9 = pneg %p1534_p8  ;;  %s144_s25 = sshll.u32 %s1457_s24, 4  ;;  %s1549_s25 = int_to_ptr.vmem [resolvable:$true] %s144_s25 }
  0x10   : > { %p1299_p12 = scmp.ne.s32.totalorder %s1813_s1, %s1298_s28  ;;  %p1305_p5 = scmp.lt.u32.totalorder %s1298_s28, %s1813_s1 }
  0x11   : > { %p1545_p11 = pnand %p1203_p9, %p1816_p1 }
  0x13   : > { %p1300_p13 = pneg %p1545_p11 }
  0x15   : > { %p1301_p0 = pnand %p1300_p13, %p1299_p12 }
  0x17   : > { %p1302_p3 = pneg %p1301_p0 }
  0x19   : > { %p1307_p7 = pnand %p1305_p5, %p1302_p3 }
  0x1b   : > { %1310 = shalt.err (!%p1307_p7)
}
  0x1c   : > { %s1311_s6 = scalar_lea.vmem %s1538_s22, 512  ;;  %p1319_p2 = scmp.lt.s32.totalorder %s1538_s22, %s1538_s22 }
  0x1d   : > { %p1312_p9 = scmp.ne.s32.totalorder %s1538_s22, %s1311_s6  ;;  %p1320_p12 = scmp.lt.s32.totalorder %s1311_s6, %s1311_s6 }
  0x1f   : > { %p1314_p10 = pnand %p1312_p9, %p1300_p13  ;;  %p1321_p0 = por %p1320_p12, %p1319_p2 }
  0x21   : > { %p1315_p1 = pneg %p1314_p10 }
  0x23   : > { %p1322_p6 = pnand %p1321_p0, %p1315_p1 }
  0x25   : > { %1325 = shalt.err (!%p1322_p6)
}
  0x26   : > { %s1458_s7 = smov 128   ;;  %s1459_s8 = smov 8  }
  0x27   : > { %1206 = dma.hbm_to_vmem [thread:$0]  (!%p1545_p11), %s1813_s1, 512, %s1538_s22, [#allocation6], %s1458_s7, %s1458_s7, %s1459_s8  }
  0x28   : > { %s1326_s21 = scalar_lea.hbm %s1814_s2, 512 }
  0x29   : > { %p1327_p2 = scmp.ne.s32.totalorder %s1814_s2, %s1326_s21  ;;  %p1333_p10 = scmp.lt.u32.totalorder %s1326_s21, %s1814_s2 }
  0x2b   : > { %p1329_p1 = pnand %p1327_p2, %p1300_p13 }
  0x2d   : > { %p1330_p6 = pneg %p1329_p1 }
  0x2f   : > { %p1335_p3 = pnand %p1333_p10, %p1330_p6 }
  0x31   : > { %1338 = shalt.err (!%p1335_p3)
}
  0x32   : > { %s1339_s22 = scalar_lea.vmem %s1549_s25, 512  ;;  %p1347_p12 = scmp.lt.s32.totalorder %s1549_s25, %s1549_s25 }
  0x33   : > { %p1340_p5 = scmp.ne.s32.totalorder %s1549_s25, %s1339_s22  ;;  %p1348_p0 = scmp.lt.s32.totalorder %s1339_s22, %s1339_s22 }
  0x35   : > { %p1342_p7 = pnand %p1340_p5, %p1300_p13  ;;  %p1349_p2 = por %p1348_p0, %p1347_p12 }
  0x37   : > { %p1343_p9 = pneg %p1342_p7 }
  0x39   : > { %p1350_p1 = pnand %p1349_p2, %p1343_p9 }
  0x3b   : > { %1353 = shalt.err (!%p1350_p1)
}
  0x3c   : > { %s1460_s29 = smov 64   ;;  %s1461_s30 = smov 4  }
  0x3d   : > { %1209 = dma.hbm_to_vmem [thread:$0]  (!%p1545_p11), %s1814_s2, 512, %s1549_s25, [#allocation6], %s1460_s29, %s1460_s29, %s1461_s30  }
  0x3e   : > { %s1604_s6 = sadd.s32 1, %s1454_s15   ;;  %s27_s8 = sadd.s32 1, %s1450_s14 }
  0x3f   : > { %s24_s7 = ssub.s32 %s1454_s15, %s1604_s6  ;;  %p34_p6 = scmp.ne.s32.totalorder %s1450_s14, %s1446_s13 }
  0x40   : > { %p25_p13 = scmp.eq.s32.totalorder %s24_s7, 0  ;;  %p35_p10 = scmp.eq.s32.totalorder %s1454_s15, 0 }
  0x41   : > { %p1823_p5 = scmp.eq.s32.totalorder %s1515_s16, 1  ;;  %p1220_p9 = scmp.lt.s32.totalorder %s1454_s15, 2 }
  0x42   : > { %s1613_s9 = scalar_select %p25_p13, %s1450_s14, %s27_s8  }
  0x43   : > { %p36_p3 = por %p35_p10, %p34_p6  ;;  %p1617_p7 = por %p1823_p5, %p34_p6 }
  0x44   : > { %s158_s23 = sand.u32 1, %s1450_s14   ;;  %s1052_s25 = sshll.u32 %s1454_s15, 6 }
  0x45   : > { %s1824_s10 = scalar_select %p1617_p7, 1, 0 }
  0x46   : > { %s1051_s11 = sshll.u32 %s158_s23, 2  ;;  %s1627_s24 = scalar_lea.hbm %s1812_s0, %s1052_s25 }
  0x47   : > { %s162_s26 = scalar_lea.vmem [#allocation2], %s1051_s11  ;;  %p1631_p11 = pnand %p1220_p9, %p36_p3 }
  0x48   : > { %s169_s27 = sshll.u32 %s162_s26, 4  ;;  %s159_s22 = scalar_lea.sflag [#allocation3], %s158_s23  ;;  %s1629_s27 = int_to_ptr.vmem [resolvable:$true] %s169_s27 }
  0x49   : > { %s1354_s29 = scalar_lea.hbm %s1627_s24, 64  ;;  %p1356_p0 = pneg %p1631_p11 }
  0x4a   : > { %p1355_p12 = scmp.ne.s32.totalorder %s1627_s24, %s1354_s29  ;;  %s1359_s5 = scalar_lea.hbm %s1812_s0, 128 }
  0x4b   : > { %p1360_p13 = scmp.lt.u32.totalorder %s1627_s24, %s1812_s0  ;;  %p1361_p6 = scmp.lt.u32.totalorder %s1359_s5, %s1354_s29 }
  0x4c   : > { %p1357_p2 = pnand %p1356_p0, %p1355_p12  ;;  %p1363_p3 = scmp.lt.u32.totalorder %s1354_s29, %s1627_s24 }
  0x4d   : > { %p1362_p10 = por %p1361_p6, %p1360_p13 }
  0x4e   : > { %p1358_p1 = pneg %p1357_p2 }
  0x4f   : > { %p1364_p5 = por %p1363_p3, %p1362_p10 }
  0x51   : > { %p1365_p9 = pnand %p1364_p5, %p1358_p1 }
  0x53   : > { %1368 = shalt.err (!%p1365_p9)
}
  0x54   : > { %s1369_s23 = scalar_lea.vmem %s1629_s27, 64  ;;  %s1462_s11 = smov [#allocation2]  }
  0x55   : > { %p1370_p12 = scmp.ne.s32.totalorder %s1629_s27, %s1369_s23  ;;  %s1374_s25 = sshll.u32 %s1462_s11, 4  ;;  %s1375_s25 = int_to_ptr.vmem [resolvable:$false] %s1374_s25 }
  0x56   : > { %s1376_s17 = scalar_lea.vmem %s1375_s25, 128  ;;  %p1377_p4 = scmp.lt.s32.totalorder %s1629_s27, %s1375_s25 }
  0x57   : > { %p1372_p2 = pnand %p1370_p12, %p1356_p0  ;;  %p1378_p13 = scmp.lt.s32.totalorder %s1376_s17, %s1369_s23 }
  0x59   : > { %p1373_p7 = pneg %p1372_p2  ;;  %p1379_p6 = por %p1378_p13, %p1377_p4 }
  0x5b   : > { %p1380_p10 = pnand %p1379_p6, %p1373_p7 }
  0x5d   : > { %1383 = shalt.err (!%p1380_p10)
}
  0x5e   : > { %1213 = dma.hbm_to_vmem [thread:$0]  (!%p1631_p11), %s1627_s24, 64, %s1629_s27, %s159_s22  }
  0x5f   : > { %178 = sbr.rel (%p1534_p8) target bundleno = 2502 (0x9c6), region = 32  ;;  %s1663_s21 = sand.u32 (!%p1534_p8), 1, %s1446_s13  }
  0x60   : > { %s1054_s26 = sshll.u32 (!%p1534_p8), %s1663_s21, 2  ;;  %s181_s29 = scalar_lea.sflag (!%p1534_p8), [#allocation3], %s1663_s21 }
  0x61   : > { %s184_s30 = scalar_lea.vmem (!%p1534_p8), [#allocation2], %s1054_s26  ;;  %p1826_p4 = scmp.ne.s32.totalorder (!%p1534_p8), %s1819_s18, 0 }
  0x66   : > { %1429 = dma.done.wait (%p1826_p4), %s181_s29, 64  }
  0x67   : > { %1431 = vsyncadd (%p1826_p4), %s181_s29, 4294967232  ;;  %p1827_p7 = scmp.eq.s32.totalorder %s1515_s16, 0 }
  0x69   : > { %1433 = dma.done.wait (%p1827_p7), [#allocation6], 1024   ;;  %p1828_p11 = pmov %p1827_p7 }
  0x6a   : > { %v1463_v0 = vmov 0   ;;  %v1272_v1 = vld [vmem:[#allocation5 + $0x4] ss:$8 sps:$4 sm:$0xff]   ;;  %v1274_v2 = vld [vmem:[#allocation5] ss:$8 sps:$4 sm:$0xff]   ;;  %vm241_vm0 = vcmask 261120  }
  0x6b   : > { %1435 = vsyncadd (%p1828_p11), [#allocation6], 4294966272  ;;  %277 = vmatprep.mubr.bf16.mxu0 %v1463_v0  ;;  %245 = vmatprep.subr.bf16.mxu0 %v1272_v1  ;;  %v1275_v3 = vld [vmem:[#allocation5 + $0x14] ss:$8 sps:$4 sm:$0xff]   ;;  %v1277_v4 = vld [vmem:[#allocation5 + $0x10] ss:$8 sps:$4 sm:$0xff]  }
  0x6c   : > { %246 = vmatpush1.bf16.msra.mxu0 %v1274_v2  ;;  %v216_v5 = vld [vmem:[%s184_s30] sm:$0xf]  ;;  %v1464_v6 = vmov 0.0   ;;  %vm1465_vm1 = vmmov 0   ;;  %vm354_vm2 = vcmask 1043456   ;;  %s1466_s18 = smov 112  }
  0x6d   : > { %247 = vmatprep.subr.bf16.mxu0 %v1275_v3  ;;  %1107 = vmatprep.subr.bf16.mxu1 %v1464_v6  ;;  %s1467_s20 = smov 64   ;;  %s1468_s24 = smov 48   ;;  %vm291_vm3 = vcmask 130048   ;;  %vm338_vm4 = vcmask 64512   ;;  %v1278_v52 = vld [vmem:[#allocation7 + $0x8] sm:$0xff]   ;;  %v1279_v58 = vld [vmem:[#allocation7] sm:$0xff]  }
  0x6e   : > { %1109 = vmatprep.mubr.msk.bf16.mxu1 %vm1465_vm1, %v1464_v6  ;;  %s1469_s27 = smov 32   ;;  %s1470_s28 = smov 96  }
  0x6f   : > { %s1471_s22 = smov 80   ;;  %s1472_s4 = smov 16  }
  0x70   : > { %248 = vmatpush1.bf16.msra.mxu0 %v1277_v4  ;;  %s1057_s5 = sshll.u32 %s1663_s21, 3  ;;  %s1080_s7 = sshll.u32 %s1515_s16, 7 }
  0x71   : > { %1113 = vmatprep.subr.bf16.mxu0 %v1464_v6  ;;  %s214_s8 = scalar_lea.vmem [#allocation8], %s1057_s5  ;;  %s1767_s17 = scalar_lea.hbm %s1815_s3, %s1080_s7 }
  0x72   : > { %s957_s23 = sshll.u32 %s214_s8, 4  ;;  %s944_s26 = scalar_lea.sflag [#allocation4], %s1663_s21  ;;  %s1769_s23 = int_to_ptr.vmem [resolvable:$true] %s957_s23 }
  0x73   : > { %1062 = vmatmul.mubr.msk.bf16.vlgmr.msra.gmra.mrb[0].mxu0 %vm241_vm0, %v216_v5  ;;  %s1384_s29 = scalar_lea.vmem %s1769_s23, 128  ;;  %p1829_p0 = scmp.ne.s32.totalorder %s1824_s10, 0 }
  0x74   : > { %1115 = vmatprep.mubr.msk.bf16.mxu0 %vm1465_vm1, %v1464_v6  ;;  %p1385_p8 = scmp.ne.s32.totalorder %s1769_s23, %s1384_s29  ;;  %s1473_s16 = smov [#allocation8]  }
  0x75   : > { %s1388_s30 = sshll.u32 %s1473_s16, 4  ;;  %s1389_s30 = int_to_ptr.vmem [resolvable:$false] %s1388_s30 }
  0x76   : > { %p1386_p1 = pnand %p1385_p8, %p1829_p0  ;;  %p1391_p5 = scmp.lt.s32.totalorder %s1769_s23, %s1389_s30 }
  0x78   : > { %p1387_p3 = pneg %p1386_p1 }
 0x146   : > { %v279_v7 = vpop.f32.mrb[0].mxu0 }
 0x147   : > { %v1682_v8 = vpack.c.bf16 %v279_v7, %v279_v7  ;;  %v281_v9 = vpop.f32.mrb[1].mxu0 }
 0x148   : > { %v1684_v10 = vpack.c.bf16 %v281_v9, %v281_v9  ;;  %v283_v11 = vpop.f32.mrb[2].mxu0 }
 0x149   : > { %401 = vrot.lane.b32.xlu1 %v1682_v8, %s1466_s18  ;;  %289 = vrot.lane.b32.xlu0 %v1682_v8, %s1467_s20  ;;  %v284_v12 = vpop.f32.mrb[3].mxu0 }
 0x14a   : > { %v356_v13 = vsel %vm354_vm2, %v1684_v10, 0 }
 0x14b   : > { %1114 = vmatpush3.bf16.msra.mxu0 %v356_v13 }
 0x14c   : > { %1125 = vmatprep.subr.bf16.mxu0 %v1464_v6 }
 0x14d   : > { %403 = vrot.lane.b32.xlu0 %v1682_v8, %s1468_s24 }
 0x1bb   : > { %v290_v14 = vpop.permute.xlu0 %289  ;;  %v402_v18 = vpop.permute.xlu1 %401 }
 0x1bc   : > { %v296_v15 = vsel %vm291_vm3, %v290_v14, 0 }
 0x1bd   : > { %1108 = vmatpush3.bf16.xpose.msra.mxu1 %v296_v15 }
 0x1be   : > { %1119 = vmatprep.subr.bf16.mxu1 %v1464_v6 }
 0x1bf   : > { %v404_v16 = vpop.permute.xlu0 %403 }
 0x1c0   : > { %v409_v17 = vsel %vm291_vm3, %v404_v16, 0 }
 0x1c4   : > { %1110 = vmatmul.mubr.msk.bf16.vlgmr.msra.gmra.mrb[0].mxu1 %vm291_vm3, %v1682_v8 }
 0x1c5   : > { %1120 = vmatpush3.bf16.xpose.msra.mxu1 %v409_v17  ;;  %1121 = vmatprep.mubr.msk.bf16.mxu1 %vm1465_vm1, %v1464_v6 }
 0x1c6   : > { %1131 = vmatprep.subr.bf16.mxu1 %v1464_v6 }
 0x1cc   : > { %1122 = vmatmul.mubr.msk.bf16.vlgmr.msra.gmra.mrb[4].mxu1 %vm291_vm3, %v402_v18 }
 0x1cd   : > { %1133 = vmatprep.mubr.msk.bf16.mxu1 %vm1465_vm1, %v1464_v6  ;;  %1132 = vmatpush3.bf16.msra.mxu1 %v1278_v52 }
 0x1ce   : > { %1137 = vmatprep.subr.bf16.mxu1 %v1464_v6 }
 0x297   : > { %v332_v19 = vpop.f32.mrb[0].mxu1 }
 0x298   : > { %v1111_v20 = vpop.f32.mrb[1].mxu1  ;;  %v339_v21 = vsel %vm338_vm4, %v332_v19, -inf }
 0x299   : > { %340 = vmax.xlane.f32.xlu1 %v339_v21  ;;  %v335_v22 = vpop.f32.mrb[2].mxu1 }
 0x29a   : > { %v1112_v23 = vpop.f32.mrb[3].mxu1  ;;  %v1280_v22 = vld [vmem:[#allocation7 + $0x10] sm:$0xff]  }
 0x29f   : > { %v445_v24 = vpop.f32.mrb[4].mxu1 }
 0x2a0   : > { %v1123_v25 = vpop.f32.mrb[5].mxu1  ;;  %v451_v26 = vsel %vm338_vm4, %v445_v24, -inf }
 0x2a1   : > { %452 = vmax.xlane.f32.xlu0 %v451_v26  ;;  %v448_v27 = vpop.f32.mrb[6].mxu1 }
 0x2a2   : > { %v1124_v28 = vpop.f32.mrb[7].mxu1 }
 0x326   : > { %v341_v29 = vpop.xlane.xlu1 %340 }
 0x327   : > { %v342_v30 = vsub.f32 %v332_v19, %v341_v29 }
 0x329   : > { %v343_v31 = vmul.f32 1.442695, %v342_v30 }
 0x32b   : > { %1282 = vpow2.f32 %v343_v31 }
 0x32e   : > { %v453_v32 = vpop.xlane.xlu0 %452 }
 0x32f   : > { %v454_v33 = vsub.f32 %v445_v24, %v453_v32 }
 0x331   : > { %v455_v34 = vmul.f32 1.442695, %v454_v33 }
 0x333   : > { %1284 = vpow2.f32 %v455_v34 }
 0x335   : > { %v1283_v35 = vpop.eup %1282 }
 0x336   : > { %v345_v36 = vsel %vm338_vm4, %v1283_v35, 0.0 }
 0x337   : > { %346 = vadd.xlane.f32.xlu0 %v345_v36 }
 0x33d   : > { %v1285_v37 = vpop.eup %1284 }
 0x33e   : > { %v457_v38 = vsel %vm338_vm4, %v1285_v37, 0.0 }
 0x33f   : > { %458 = vadd.xlane.f32.xlu1 %v457_v38 }
 0x34d   : > { %464 = vrot.lane.b32.xlu0 %v1684_v10, %s1466_s18  ;;  %s1390_s18 = scalar_lea.vmem %s1389_s30, 256 }
 0x34e   : > { %p1392_p9 = scmp.lt.s32.totalorder %s1390_s18, %s1384_s29 }
 0x350   : > { %616 = vrot.lane.b32.xlu1 %v1682_v8, %s1469_s27  ;;  %p1393_p12 = por %p1392_p9, %p1391_p5 }
 0x352   : > { %p1394_p2 = pnand %p1393_p12, %p1387_p3 }
 0x354   : > { %614 = vrot.lane.b32.xlu1 %v1682_v8, %s1470_s28 }
 0x3c4   : > { %v347_v39 = vpop.xlane.xlu0 %346 }
 0x3c5   : > { %1286 = vrcp.f32 %v347_v39 }
 0x3c8   : > { %v465_v43 = vpop.permute.xlu0 %464 }
 0x3c9   : > { %v470_v45 = vsel %vm354_vm2, %v465_v43, 0 }
 0x3cc   : > { %v459_v40 = vpop.xlane.xlu1 %458 }
 0x3cd   : > { %1288 = vrcp.f32 %v459_v40 }
 0x3cf   : > { %v1287_v41 = vpop.eup %1286 }
 0x3d0   : > { %v349_v42 = vmul.f32 %v1287_v41, %v1283_v35  ;;  %v617_v48 = vpop.permute.xlu1 %616 }
 0x3d1   : > { %v622_v50 = vsel %vm291_vm3, %v617_v48, 0 }
 0x3d2   : > { %v350_v44 = vpack.c.bf16 %v349_v42, %v349_v42  ;;  %v1281_v42 = vld [vmem:[#allocation7 + $0x18] sm:$0xff]  }
 0x3d4   : > { %1116 = vmatmul.mubr.msk.bf16.vlgmr.msra.gmra.mrb[4].mxu0 %vm338_vm4, %v350_v44  ;;  %v615_v51 = vpop.permute.xlu1 %614 }
 0x3d5   : > { %1126 = vmatpush3.bf16.msra.mxu0 %v470_v45  ;;  %1127 = vmatprep.mubr.msk.bf16.mxu0 %vm1465_vm1, %v1464_v6 }
 0x3d6   : > { %1143 = vmatprep.subr.bf16.mxu0 %v1464_v6 }
 0x3d7   : > { %v1289_v46 = vpop.eup %1288 }
 0x3d8   : > { %v461_v47 = vmul.f32 %v1289_v46, %v1285_v37 }
 0x3da   : > { %v462_v49 = vpack.c.bf16 %v461_v47, %v461_v47 }
 0x3dc   : > { %1128 = vmatmul.mubr.msk.bf16.vlgmr.msra.gmra.mrb[8].mxu0 %vm338_vm4, %v462_v49 }
 0x3dd   : > { %1145 = vmatprep.mubr.msk.bf16.mxu0 %vm1465_vm1, %v1464_v6 }
 0x3de   : > { %1144 = vmatpush3.bf16.xpose.msra.mxu0 %v622_v50 }
 0x3df   : > { %1149 = vmatprep.subr.bf16.mxu0 %v1464_v6 }
 0x3e5   : > { %1146 = vmatmul.mubr.msk.bf16.vlgmr.msra.gmra.mrb[12].mxu0 %vm291_vm3, %v615_v51 }
 0x3e6   : > { %1151 = vmatprep.mubr.msk.bf16.mxu0 %vm1465_vm1, %v1464_v6 }
 0x4a7   : > { %v392_v53 = vpop.f32.mrb[4].mxu0 }
 0x4a8   : > { %v1117_v54 = vpop.f32.mrb[5].mxu0  ;;  %v398_v4 = vpack.c.bf16 %v392_v53, %v392_v53 }
 0x4a9   : > { %v395_v55 = vpop.f32.mrb[6].mxu0 }
 0x4aa   : > { %v1118_v56 = vpop.f32.mrb[7].mxu0 }
 0x4af   : > { %v506_v57 = vpop.f32.mrb[8].mxu0 }
 0x4b0   : > { %v512_v59 = vpack.c.bf16 %v506_v57, %v506_v57  ;;  %v1129_v60 = vpop.f32.mrb[9].mxu0 }
 0x4b1   : > { %v509_v61 = vpop.f32.mrb[10].mxu0 }
 0x4b2   : > { %v1130_v62 = vpop.f32.mrb[11].mxu0  ;;  %1134 = vmatmul.mubr.msk.bf16.vlgmr.msra.gmra.mrb[8].mxu1 %vm291_vm3, %v512_v59 }
 0x4b3   : > { %1138 = vmatpush3.bf16.msra.mxu1 %v1279_v58  ;;  %1139 = vmatprep.mubr.msk.bf16.mxu1 %vm1465_vm1, %v1464_v6 }
 0x4b4   : > { %1155 = vmatprep.subr.bf16.mxu1 %v1464_v6 }
 0x4b8   : > { %v658_v63 = vpop.f32.mrb[12].mxu0 }
 0x4b9   : > { %v1147_v0 = vpop.f32.mrb[13].mxu0  ;;  %v664_v1 = vsel %vm338_vm4, %v658_v63, -inf }
 0x4ba   : > { %665 = vmax.xlane.f32.xlu0 %v664_v1  ;;  %v661_v2 = vpop.f32.mrb[14].mxu0 }
 0x4bb   : > { %v1148_v3 = vpop.f32.mrb[15].mxu0 }
 0x4be   : > { %1140 = vmatmul.mubr.msk.bf16.vlgmr.msra.gmra.mrb[8].mxu1 %vm291_vm3, %v398_v4 }
 0x4bf   : > { %1157 = vmatprep.mubr.msk.bf16.mxu1 %vm1465_vm1, %v1464_v6  ;;  %1156 = vmatpush3.bf16.msra.mxu1 %v1280_v22 }
 0x4c0   : > { %1167 = vmatprep.subr.bf16.mxu1 %v1464_v6 }
 0x4d0   : > { %676 = vrot.lane.b32.xlu0 %v1684_v10, %s1470_s28 }
 0x4d4   : > { %778 = vrot.lane.b32.xlu0 %v1682_v8, %s1471_s22 }
 0x547   : > { %v666_v5 = vpop.xlane.xlu0 %665 }
 0x548   : > { %v667_v7 = vsub.f32 %v658_v63, %v666_v5 }
 0x54a   : > { %v668_v9 = vmul.f32 1.442695, %v667_v7 }
 0x54b   : > { %v677_v11 = vpop.permute.xlu0 %676 }
 0x54c   : > { %1290 = vpow2.f32 %v668_v9  ;;  %v682_v12 = vsel %vm354_vm2, %v677_v11, 0 }
 0x54d   : > { %1150 = vmatpush3.bf16.msra.mxu0 %v682_v12 }
 0x54e   : > { %1161 = vmatprep.subr.bf16.mxu0 %v1464_v6 }
 0x54f   : > { %v779_v21 = vpop.permute.xlu0 %778 }
 0x556   : > { %v1291_v13 = vpop.eup %1290 }
 0x557   : > { %v670_v14 = vsel %vm338_vm4, %v1291_v13, 0.0 }
 0x558   : > { %671 = vadd.xlane.f32.xlu1 %v670_v14 }
 0x569   : > { %780 = vrot.lane.b32.xlu1 %v1682_v8, %s1472_s4 }
 0x5e5   : > { %v672_v15 = vpop.xlane.xlu1 %671 }
 0x5e6   : > { %1292 = vrcp.f32 %v672_v15 }
 0x5e9   : > { %v781_v18 = vpop.permute.xlu1 %780 }
 0x5ea   : > { %v786_v20 = vsel %vm291_vm3, %v781_v18, 0 }
 0x5f0   : > { %v1293_v16 = vpop.eup %1292 }
 0x5f1   : > { %v674_v17 = vmul.f32 %v1293_v16, %v1291_v13 }
 0x5f3   : > { %v675_v19 = vpack.c.bf16 %v674_v17, %v674_v17 }
 0x5f5   : > { %1152 = vmatmul.mubr.msk.bf16.vlgmr.msra.gmra.mrb[16].mxu0 %vm338_vm4, %v675_v19 }
 0x5f6   : > { %1162 = vmatpush3.bf16.xpose.msra.mxu0 %v786_v20  ;;  %1163 = vmatprep.mubr.msk.bf16.mxu0 %vm1465_vm1, %v1464_v6 }
 0x5fd   : > { %1164 = vmatmul.mubr.msk.bf16.vlgmr.msra.gmra.mrb[20].mxu0 %vm291_vm3, %v779_v21 }
 0x6c8   : > { %v718_v8 = vpop.f32.mrb[16].mxu0 }
 0x6c9   : > { %v724_v23 = vpack.c.bf16 %v718_v8, %v718_v8  ;;  %v1153_v24 = vpop.f32.mrb[17].mxu0 }
 0x6ca   : > { %v721_v25 = vpop.f32.mrb[18].mxu0 }
 0x6cb   : > { %v1154_v26 = vpop.f32.mrb[19].mxu0  ;;  %1158 = vmatmul.mubr.msk.bf16.vlgmr.msra.gmra.mrb[8].mxu1 %vm291_vm3, %v724_v23 }
 0x6cc   : > { %1169 = vmatprep.mubr.msk.bf16.mxu1 %vm1465_vm1, %v1464_v6 }
 0x6d0   : > { %v822_v27 = vpop.f32.mrb[20].mxu0 }
 0x6d1   : > { %v1165_v28 = vpop.f32.mrb[21].mxu0  ;;  %v828_v29 = vsel %vm338_vm4, %v822_v27, -inf }
 0x6d2   : > { %829 = vmax.xlane.f32.xlu1 %v828_v29  ;;  %v825_v30 = vpop.f32.mrb[22].mxu0 }
 0x6d3   : > { %v1166_v31 = vpop.f32.mrb[23].mxu0 }
 0x75f   : > { %v830_v32 = vpop.xlane.xlu1 %829 }
 0x760   : > { %v831_v33 = vsub.f32 %v822_v27, %v830_v32 }
 0x762   : > { %v832_v34 = vmul.f32 1.442695, %v831_v33 }
 0x764   : > { %1294 = vpow2.f32 %v832_v34 }
 0x76e   : > { %v1295_v35 = vpop.eup %1294 }
 0x76f   : > { %v834_v36 = vsel %vm338_vm4, %v1295_v35, 0.0 }
 0x770   : > { %835 = vadd.xlane.f32.xlu0 %v834_v36 }
 0x786   : > { %840 = vrot.lane.b32.xlu0 %v1684_v10, %s1471_s22 }
 0x7fd   : > { %v836_v37 = vpop.xlane.xlu0 %835 }
 0x7fe   : > { %1296 = vrcp.f32 %v836_v37 }
 0x801   : > { %v841_v38 = vpop.permute.xlu0 %840 }
 0x802   : > { %v846_v39 = vsel %vm354_vm2, %v841_v38, 0 }
 0x803   : > { %1168 = vmatpush3.bf16.msra.mxu1 %v846_v39 }
 0x804   : > { %1173 = vmatprep.subr.bf16.mxu1 %v1464_v6 }
 0x808   : > { %v1297_v40 = vpop.eup %1296 }
 0x809   : > { %v838_v41 = vmul.f32 %v1297_v40, %v1295_v35 }
 0x80b   : > { %v839_v43 = vpack.c.bf16 %v838_v41, %v838_v41 }
 0x80d   : > { %1170 = vmatmul.mubr.msk.bf16.vlgmr.msra.gmra.mrb[12].mxu1 %vm338_vm4, %v839_v43 }
 0x80e   : > { %1174 = vmatpush3.bf16.msra.mxu1 %v1281_v42  ;;  %1175 = vmatprep.mubr.msk.bf16.mxu1 %vm1465_vm1, %v1464_v6 }
 0x8e0   : > { %v882_v10 = vpop.f32.mrb[12].mxu1 }
 0x8e1   : > { %v888_v44 = vpack.c.bf16 %v882_v10, %v882_v10  ;;  %v1171_v45 = vpop.f32.mrb[13].mxu1 }
 0x8e2   : > { %v885_v46 = vpop.f32.mrb[14].mxu1 }
 0x8e3   : > { %v1172_v47 = vpop.f32.mrb[15].mxu1  ;;  %1176 = vmatmul.mubr.msk.bf16.vlgmr.msra.gmra.mrb[8].mxu1 %vm291_vm3, %v888_v44 }
 0x9b6   : > { %v935_v6 = vpop.f32.mrb[8].mxu1 }
 0x9b7   : > { %942 = vst.msk [vmem:[%s214_s8] sm:$0xff] %vm241_vm0, %v935_v6  ;;  %v1177_v48 = vpop.f32.mrb[9].mxu1 }
 0x9b8   : > { %v938_v49 = vpop.f32.mrb[10].mxu1 }
 0x9b9   : > { %1397 = shalt.err (!%p1394_p2)
}
 0x9ba   : > { %s1398_s21 = scalar_lea.hbm %s1767_s17, 128  ;;  %s1402_s27 = scalar_lea.hbm %s1815_s3, 256 }
 0x9bb   : > { %p1399_p13 = scmp.ne.s32.totalorder %s1767_s17, %s1398_s21  ;;  %p1403_p4 = scmp.lt.u32.totalorder %s1767_s17, %s1815_s3 }
 0x9bc   : > { %p1404_p7 = scmp.lt.u32.totalorder %s1402_s27, %s1398_s21  ;;  %p1406_p8 = scmp.lt.u32.totalorder %s1398_s21, %s1767_s17 }
 0x9bd   : > { %p1400_p6 = pnand %p1399_p13, %p1829_p0 }
 0x9be   : > { %p1405_p11 = por %p1404_p7, %p1403_p4 }
 0x9bf   : > { %p1401_p10 = pneg %p1400_p6 }
 0x9c0   : > { %p1407_p1 = por %p1406_p8, %p1405_p11 }
 0x9c2   : > { %p1408_p3 = pnand %p1407_p1, %p1401_p10 }
 0x9c4   : > { %1411 = shalt.err (!%p1408_p3)
}
 0x9c5   : > { %1201 = dma.vmem_to_hbm [thread:$0]  (%p1829_p0), %s1769_s23, 128, %s1767_s17, %s944_s26   ;;  %v1178_v50 = vpop.f32.mrb[11].mxu1 }
 0x9c6 PF: > { %s969_s4 = sand.u32 1, %s1442_s12   ;;  %p1830_p5 = scmp.ne.s32.totalorder %s1820_s19, 0 }
 0x9c7   : > { %p1831_p9 = scmp.ge.s32.totalorder %s1454_s15, 2  ;;  %s970_s5 = scalar_lea.sflag [#allocation4], %s969_s4 }
 0x9c9   : > { %p1215_p12 = pnand %p1831_p9, %p1830_p5 }
 0x9cb   : > { %1437 = dma.done.wait (!%p1215_p12), %s970_s5, 128  }
 0x9cc   : > { %1439 = vsyncadd (!%p1215_p12), %s970_s5, 4294967168  ;;  %p17_p2 = scmp.ge.s32.totalorder %s1604_s6, 4   ;;  %s1832_s12 = smov %s1446_s13 }
 0x9cd   : > { %s1833_s13 = smov %s1450_s14  ;;  %s1834_s14 = smov %s1613_s9 }
 0x9ce   : > { %s1835_s15 = smov %s1604_s6  ;;  %19 = sbr.rel (!%p17_p2) target bundleno = 6 (0x6), region = 88 }
 0x9d5   :  { %975 = vsyncpa [#allocation3], 1 }
 0x9d6   :  { %977 = vsyncpa [#allocation3 + $0x1], 1 }
 0x9d7   :  { %978 = vsyncpa [#allocation6], 1 }
 0x9d8   :  { %979 = vsyncpa [#allocation4], 1 }
 0x9d9   :  { %981 = vsyncpa [#allocation4 + $0x1], 1 }

</bundles_post_ra>
